<compile_context>
chip_gen: v7x
topology: tpu7x:2x2x1
jax: 0.10.0
libtpu: 0.0.40
codegen_flags: <defaults>
</compile_context>

<pallas_src>
import numpy as np
import jax
import jax.numpy as jnp
from jax.experimental import pallas as pl
from jax.experimental.pallas import tpu as pltpu


def _round_up(n, m):
    return ((n + m - 1) // m) * m


# ----------------------------- Pallas kernel -------------------------------
def actor_mlp_kernel(x_ref, avail_ref, w1_ref, b1_ref, w2_ref, b2_ref,
                     w3_ref, b3_ref, out_ref):
    # fc1 + tanh  (bf16 operands, f32 accumulate on the MXU)
    x = x_ref[...].astype(jnp.bfloat16)
    h1 = jnp.tanh(
        jnp.dot(x, w1_ref[...], preferred_element_type=jnp.float32)
        + b1_ref[...])

    # fc2 + tanh
    h2 = jnp.tanh(
        jnp.dot(h1.astype(jnp.bfloat16), w2_ref[...],
                preferred_element_type=jnp.float32)
        + b2_ref[...])

    # fc3 logits + bias + additive availability mask (avail==0 -> -1e10)
    logits = (jnp.dot(h2.astype(jnp.bfloat16), w3_ref[...],
                      preferred_element_type=jnp.float32)
              + b3_ref[...]
              + (avail_ref[...].astype(jnp.float32) - 1.0) * jnp.float32(1e10))

    # softmax over the action dim (f32, exact divide so rows sum to 1)
    m = jnp.max(logits, axis=-1, keepdims=True)
    e = jnp.exp(logits - m)
    denom = jnp.sum(e, axis=-1, keepdims=True)
    out_ref[...] = (e / denom).astype(out_ref.dtype)


# ------------------------------- wrapper ------------------------------------
def actor_mlp_forward(x, avail, w1, b1, w2, b2, w3, b3, *, block_b=2048):
    """x:(B,D_in) f32, avail:(B,A) {0,1}; weights stored (in,out)."""
    B, D_in = x.shape
    H = w1.shape[1]
    A = w3.shape[1]

    # hidden dim padded to 128 lanes (weights are tiny and VMEM-resident)
    Hp = _round_up(H, 128)

    # Batch tiling: minimise pad rows, keep tiles <= block_b, and use >= 2
    # grid steps when the batch allows (v7x has 2 TensorCores per chip).
    SUBLANE = 16  # bf16 sublane packing for the avail tile
    n_steps = max(pl.cdiv(B, block_b), 1)
    if B >= 2 * SUBLANE:
        n_steps = max(n_steps, 2)
    TB = _round_up(pl.cdiv(B, n_steps), SUBLANE)
    n_steps = pl.cdiv(B, TB)
    Bp = n_steps * TB

    bf16, f32 = jnp.bfloat16, jnp.float32

    # Resident bf16 weights, hidden dim zero-padded (pad rows/cols add 0).
    # The action dim stays un-padded everywhere.
    w1p = jnp.zeros((D_in, Hp), bf16).at[:, :H].set(w1.astype(bf16))
    w2p = jnp.zeros((Hp, Hp), bf16).at[:H, :H].set(w2.astype(bf16))
    w3p = jnp.zeros((Hp, A), bf16).at[:H, :].set(w3.astype(bf16))
    b1p = jnp.zeros((1, Hp), f32).at[:, :H].set(b1.reshape(1, H).astype(f32))
    b2p = jnp.zeros((1, Hp), f32).at[:, :H].set(b2.reshape(1, H).astype(f32))
    b3p = b3.reshape(1, A).astype(f32)

    # Per-row streams: x stays f32/un-padded lanes; avail goes bf16/un-padded.
    x_in = x
    avail_in = avail.astype(bf16)
    if Bp != B:  # only pad the (few) tail rows of the batch when needed
        x_in = jnp.pad(x_in, ((0, Bp - B), (0, 0)))
        avail_in = jnp.pad(avail_in, ((0, Bp - B), (0, 0)))

    # VMEM budget estimate (with 2x headroom) so a large TB never hits the
    # smaller scoped-VMEM defaults (16 MiB on v5e); capped below v7x physical.
    est_vmem = 2 * (
        2 * TB * (D_in * 4 + A * 2 + A * 4)          # double-buffered streams
        + 2 * ((D_in + Hp) * Hp + Hp * A) * 2        # resident bf16 weights
        + 2 * (2 * Hp + A) * 4                       # resident f32 biases
        + 3 * TB * Hp * 4)                           # live f32 intermediates
    vmem_limit = int(min(max(est_vmem, 32 * 1024 * 1024), 48 * 1024 * 1024))

    # NOTE: pipeline_mode=pl.Buffered(1) on the constant-index weight specs
    # would halve their resident VMEM for large hidden dims; negligible at
    # H <= 128, so omitted to keep lowering maximally portable.
    out = pl.pallas_call(
        actor_mlp_kernel,
        out_shape=jax.ShapeDtypeStruct((Bp, A), f32),
        grid=(n_steps,),
        in_specs=[
            pl.BlockSpec((TB, D_in), lambda i: (i, 0)),   # x rows (pipelined)
            pl.BlockSpec((TB, A), lambda i: (i, 0)),      # avail rows (pipelined)
            pl.BlockSpec((D_in, Hp), lambda i: (0, 0)),   # W1 (VMEM resident)
            pl.BlockSpec((1, Hp), lambda i: (0, 0)),      # b1 (resident)
            pl.BlockSpec((Hp, Hp), lambda i: (0, 0)),     # W2 (resident)
            pl.BlockSpec((1, Hp), lambda i: (0, 0)),      # b2 (resident)
            pl.BlockSpec((Hp, A), lambda i: (0, 0)),      # W3 (resident)
            pl.BlockSpec((1, A), lambda i: (0, 0)),       # b3 (resident)
        ],
        out_specs=pl.BlockSpec((TB, A), lambda i: (i, 0)),
        compiler_params=pltpu.CompilerParams(
            dimension_semantics=("parallel",),
            vmem_limit_bytes=vmem_limit),
    )(x_in, avail_in, w1p, b1p, w2p, b2p, w3p, b3p)

    return out[:B]


# ----------------------- deterministic parameter init ----------------------
def orthogonal(key, rows, cols, gain=1.0):
    """Mimic torch.nn.init.orthogonal_ for a (rows, cols) weight."""
    n = max(rows, cols)
    a = jax.random.normal(key, (n, n), dtype=jnp.float32)
    q, r = jnp.linalg.qr(a)
    q = q * jnp.sign(jnp.diag(r))[None, :]
    return gain * q[:rows, :cols]


def init_params(key, input_dim, hidden_dim, action_dim):
    k1, k2, k3 = jax.random.split(key, 3)
    # PyTorch weights are (out, in); orthogonal_init is applied there, then
    # transpose to (in, out) for the x @ W convention used in the kernel.
    w1 = orthogonal(k1, hidden_dim, input_dim, gain=1.0).T
    w2 = orthogonal(k2, hidden_dim, hidden_dim, gain=1.0).T
    w3 = orthogonal(k3, action_dim, hidden_dim, gain=0.01).T
    b1 = jnp.zeros((1, hidden_dim), jnp.float32)
    b2 = jnp.zeros((1, hidden_dim), jnp.float32)
    b3 = jnp.zeros((1, action_dim), jnp.float32)
    return w1, b1, w2, b2, w3, b3


# ------------------------------ references ----------------------------------
def actor_mlp_ref(x, avail, w1, b1, w2, b2, w3, b3, matmul_dtype=jnp.float32):
    c = lambda a: a.astype(matmul_dtype)
    h1 = jnp.tanh(jnp.dot(c(x), c(w1), preferred_element_type=jnp.float32) + b1)
    h2 = jnp.tanh(jnp.dot(c(h1), c(w2), preferred_element_type=jnp.float32) + b2)
    z = jnp.dot(c(h2), c(w3), preferred_element_type=jnp.float32) + b3
    z = jnp.where(avail == 0.0, -1e10, z)
    return jax.nn.softmax(z, axis=-1)


if __name__ == "__main__":
    # small shapes implied by the module: actor_input_dim, mlp_hidden_dim,
    # action_dim, batch of agents (batch chosen to exercise >1 grid step and
    # the batch-padding path).
    batch, input_dim, hidden_dim, action_dim = 40, 16, 32, 8

    key = jax.random.PRNGKey(0)
    k_in, k_avail, k_par = jax.random.split(key, 3)

    x = jax.random.normal(k_in, (batch, input_dim), dtype=jnp.float32)
    # availability mask: some actions unavailable, but keep >=1 available
    avail = (jax.random.uniform(k_avail, (batch, action_dim)) > 0.3)
    avail = avail.at[:, 0].set(True).astype(jnp.float32)

    w1, b1, w2, b2, w3, b3 = init_params(k_par, input_dim, hidden_dim,
                                         action_dim)

    prob = actor_mlp_forward(x, avail, w1, b1, w2, b2, w3, b3)
    prob = jax.block_until_ready(prob)
    p = np.asarray(prob)

    # reference mirroring the kernel's bf16 matmuls (tight check) ...
    ref_bf16 = np.asarray(actor_mlp_ref(x, avail, w1, b1, w2, b2, w3, b3,
                                        matmul_dtype=jnp.bfloat16))
    np.testing.assert_allclose(p, ref_bf16, rtol=5e-3, atol=5e-4)
    # ... and the pure-f32 PyTorch-equivalent reference (loose check)
    ref_f32 = np.asarray(actor_mlp_ref(x, avail, w1, b1, w2, b2, w3, b3,
                                       matmul_dtype=jnp.float32))
    np.testing.assert_allclose(p, ref_f32, rtol=5e-2, atol=5e-3)

    # rows sum to 1 (exact divide in the kernel) and masked actions get ~0
    np.testing.assert_allclose(p.sum(-1), np.ones(batch), rtol=0, atol=1e-3)
    assert float(np.max(p[np.asarray(avail) == 0.0], initial=0.0)) < 1e-6

    print("KERNEL_OK")
</pallas_src>

<mosaic_0001>
module attributes {stable_mosaic.version = 11 : i64} {
  func.func @actor_mlp_kernel(%arg0: i32, %arg1: memref<32x16xf32, #tpu.memory_space<vmem>>, %arg2: memref<32x8xbf16, #tpu.memory_space<vmem>>, %arg3: memref<16x128xbf16, #tpu.memory_space<vmem>>, %arg4: memref<1x128xf32, #tpu.memory_space<vmem>>, %arg5: memref<128x128xbf16, #tpu.memory_space<vmem>>, %arg6: memref<1x128xf32, #tpu.memory_space<vmem>>, %arg7: memref<128x8xbf16, #tpu.memory_space<vmem>>, %arg8: memref<1x8xf32, #tpu.memory_space<vmem>>, %arg9: memref<32x8xf32, #tpu.memory_space<vmem>>) attributes {dimension_semantics = [#tpu.dimension_semantics<parallel>], iteration_bounds = array<i64: 2>, scalar_prefetch = 0 : i64, scratch_operands = 0 : i64, tpu.core_type = #tpu.core_type<tc>, window_params = [{transform_indices = @transform_0, window_bounds = array<i64: 32, 16>}, {transform_indices = @transform_1, window_bounds = array<i64: 32, 8>}, {pipeline_mode = #tpu.pipeline_mode<synchronous>, transform_indices = @transform_2, window_bounds = array<i64: 16, 128>}, {pipeline_mode = #tpu.pipeline_mode<synchronous>, transform_indices = @transform_3, window_bounds = array<i64: 1, 128>}, {pipeline_mode = #tpu.pipeline_mode<synchronous>, transform_indices = @transform_4, window_bounds = array<i64: 128, 128>}, {pipeline_mode = #tpu.pipeline_mode<synchronous>, transform_indices = @transform_5, window_bounds = array<i64: 1, 128>}, {pipeline_mode = #tpu.pipeline_mode<synchronous>, transform_indices = @transform_6, window_bounds = array<i64: 128, 8>}, {pipeline_mode = #tpu.pipeline_mode<synchronous>, transform_indices = @transform_7, window_bounds = array<i64: 1, 8>}, {transform_indices = @transform_8, window_bounds = array<i64: 32, 8>}]} {
    %c0 = arith.constant 0 : index
    %c0_0 = arith.constant 0 : index
    %0 = vector.load %arg1[%c0, %c0_0] : memref<32x16xf32, #tpu.memory_space<vmem>>, vector<32x16xf32>
    %1 = arith.truncf %0 : vector<32x16xf32> to vector<32x16xbf16>
    %c0_1 = arith.constant 0 : index
    %c0_2 = arith.constant 0 : index
    %2 = vector.load %arg3[%c0_1, %c0_2] : memref<16x128xbf16, #tpu.memory_space<vmem>>, vector<16x128xbf16>
    %cst = arith.constant dense<0.000000e+00> : vector<32x128xf32>
    %3 = tpu.matmul %1, %2, %cst {dimension_numbers = #tpu.dot_dimension_numbers<[1], [0], [0], [1], [0, 0, 1, 1], [], []>} : vector<32x16xbf16>, vector<16x128xbf16>, vector<32x128xf32> -> vector<32x128xf32>
    %c0_3 = arith.constant 0 : index
    %c0_4 = arith.constant 0 : index
    %4 = vector.load %arg4[%c0_3, %c0_4] : memref<1x128xf32, #tpu.memory_space<vmem>>, vector<1x128xf32>
    %5 = vector.broadcast %4 : vector<1x128xf32> to vector<32x128xf32>
    %6 = arith.addf %3, %5 : vector<32x128xf32>
    %7 = math.tanh %6 : vector<32x128xf32>
    %8 = arith.truncf %7 : vector<32x128xf32> to vector<32x128xbf16>
    %c0_5 = arith.constant 0 : index
    %c0_6 = arith.constant 0 : index
    %9 = vector.load %arg5[%c0_5, %c0_6] : memref<128x128xbf16, #tpu.memory_space<vmem>>, vector<128x128xbf16>
    %cst_7 = arith.constant dense<0.000000e+00> : vector<32x128xf32>
    %10 = tpu.matmul %8, %9, %cst_7 {dimension_numbers = #tpu.dot_dimension_numbers<[1], [0], [0], [1], [0, 0, 1, 1], [], []>} : vector<32x128xbf16>, vector<128x128xbf16>, vector<32x128xf32> -> vector<32x128xf32>
    %c0_8 = arith.constant 0 : index
    %c0_9 = arith.constant 0 : index
    %11 = vector.load %arg6[%c0_8, %c0_9] : memref<1x128xf32, #tpu.memory_space<vmem>>, vector<1x128xf32>
    %12 = vector.broadcast %11 : vector<1x128xf32> to vector<32x128xf32>
    %13 = arith.addf %10, %12 : vector<32x128xf32>
    %14 = math.tanh %13 : vector<32x128xf32>
    %15 = arith.truncf %14 : vector<32x128xf32> to vector<32x128xbf16>
    %c0_10 = arith.constant 0 : index
    %c0_11 = arith.constant 0 : index
    %16 = vector.load %arg7[%c0_10, %c0_11] : memref<128x8xbf16, #tpu.memory_space<vmem>>, vector<128x8xbf16>
    %cst_12 = arith.constant dense<0.000000e+00> : vector<32x8xf32>
    %17 = tpu.matmul %15, %16, %cst_12 {dimension_numbers = #tpu.dot_dimension_numbers<[1], [0], [0], [1], [0, 0, 1, 1], [], []>} : vector<32x128xbf16>, vector<128x8xbf16>, vector<32x8xf32> -> vector<32x8xf32>
    %c0_13 = arith.constant 0 : index
    %c0_14 = arith.constant 0 : index
    %18 = vector.load %arg8[%c0_13, %c0_14] : memref<1x8xf32, #tpu.memory_space<vmem>>, vector<1x8xf32>
    %19 = vector.broadcast %18 : vector<1x8xf32> to vector<32x8xf32>
    %20 = arith.addf %17, %19 : vector<32x8xf32>
    %c0_15 = arith.constant 0 : index
    %c0_16 = arith.constant 0 : index
    %21 = vector.load %arg2[%c0_15, %c0_16] : memref<32x8xbf16, #tpu.memory_space<vmem>>, vector<32x8xbf16>
    %22 = arith.extf %21 : vector<32x8xbf16> to vector<32x8xf32>
    %cst_17 = arith.constant 1.000000e+00 : f32
    %23 = vector.broadcast %cst_17 : f32 to vector<32x8xf32>
    %24 = arith.subf %22, %23 : vector<32x8xf32>
    %cst_18 = arith.constant 1.000000e+10 : f32
    %25 = vector.broadcast %cst_18 : f32 to vector<32x8xf32>
    %26 = arith.mulf %24, %25 : vector<32x8xf32>
    %27 = arith.addf %20, %26 : vector<32x8xf32>
    %cst_19 = arith.constant dense<0xFF800000> : vector<32xf32>
    %28 = vector.multi_reduction <maximumf>, %27, %cst_19 [1] : vector<32x8xf32> to vector<32xf32>
    %29 = vector.shape_cast %28 : vector<32xf32> to vector<32x1xf32>
    %30 = vector.broadcast %29 : vector<32x1xf32> to vector<32x8xf32>
    %31 = arith.subf %27, %30 : vector<32x8xf32>
    %32 = math.exp %31 : vector<32x8xf32>
    %cst_20 = arith.constant dense<0.000000e+00> : vector<32xf32>
    %33 = vector.multi_reduction <add>, %32, %cst_20 [1] : vector<32x8xf32> to vector<32xf32>
    %34 = vector.shape_cast %33 : vector<32xf32> to vector<32x1xf32>
    %35 = vector.broadcast %34 : vector<32x1xf32> to vector<32x8xf32>
    %36 = arith.divf %32, %35 : vector<32x8xf32>
    %c0_21 = arith.constant 0 : index
    %c0_22 = arith.constant 0 : index
    %37 = vector.load %arg9[%c0_21, %c0_22] : memref<32x8xf32, #tpu.memory_space<vmem>>, vector<32x8xf32>
    tpu.vector_store %arg9[%c0_21, %c0_22], %36 {strides = array<i32>} : memref<32x8xf32, #tpu.memory_space<vmem>>, vector<32x8xf32>,
    return
  }
  func.func @transform_0(%arg0: i32) -> (i32, i32) {
    %c0_i32 = arith.constant 0 : i32
    %c0_i32_0 = arith.constant 0 : i32
    return %arg0, %c0_i32 : i32, i32
  }
  func.func @transform_1(%arg0: i32) -> (i32, i32) {
    %c0_i32 = arith.constant 0 : i32
    %c0_i32_0 = arith.constant 0 : i32
    return %arg0, %c0_i32 : i32, i32
  }
  func.func @transform_2(%arg0: i32) -> (i32, i32) {
    %c0_i32 = arith.constant 0 : i32
    %c0_i32_0 = arith.constant 0 : i32
    %c0_i32_1 = arith.constant 0 : i32
    return %c0_i32, %c0_i32_0 : i32, i32
  }
  func.func @transform_3(%arg0: i32) -> (i32, i32) {
    %c0_i32 = arith.constant 0 : i32
    %c0_i32_0 = arith.constant 0 : i32
    %c0_i32_1 = arith.constant 0 : i32
    return %c0_i32, %c0_i32_0 : i32, i32
  }
  func.func @transform_4(%arg0: i32) -> (i32, i32) {
    %c0_i32 = arith.constant 0 : i32
    %c0_i32_0 = arith.constant 0 : i32
    %c0_i32_1 = arith.constant 0 : i32
    return %c0_i32, %c0_i32_0 : i32, i32
  }
  func.func @transform_5(%arg0: i32) -> (i32, i32) {
    %c0_i32 = arith.constant 0 : i32
    %c0_i32_0 = arith.constant 0 : i32
    %c0_i32_1 = arith.constant 0 : i32
    return %c0_i32, %c0_i32_0 : i32, i32
  }
  func.func @transform_6(%arg0: i32) -> (i32, i32) {
    %c0_i32 = arith.constant 0 : i32
    %c0_i32_0 = arith.constant 0 : i32
    %c0_i32_1 = arith.constant 0 : i32
    return %c0_i32, %c0_i32_0 : i32, i32
  }
  func.func @transform_7(%arg0: i32) -> (i32, i32) {
    %c0_i32 = arith.constant 0 : i32
    %c0_i32_0 = arith.constant 0 : i32
    %c0_i32_1 = arith.constant 0 : i32
    return %c0_i32, %c0_i32_0 : i32, i32
  }
  func.func @transform_8(%arg0: i32) -> (i32, i32) {
    %c0_i32 = arith.constant 0 : i32
    %c0_i32_0 = arith.constant 0 : i32
    return %arg0, %c0_i32 : i32, i32
  }
}

</mosaic_0001>

<bundles_post_ra>
// kernel: tpu_custom_call.1
= control target key start
LH: loop header
LB: loop body
LE: loop exit
PB: predicated region body
PF: predicated region fallthrough
CT: control target
= control target key end

     0   :  { %s1025_s27 = smov 0   ;;  %s1125_s0 = inlined_call_operand.vmem [shape: f32[64,16], index: 0, kind: input, shape index: {}]   ;;  %s1126_s1 = inlined_call_operand.vmem [shape: bf16[64,8], index: 1, kind: input, shape index: {}]   ;;  %s1127_s2 = inlined_call_operand.vmem [shape: bf16[16,128], index: 2, kind: input, shape index: {}]   ;;  %s1128_s3 = inlined_call_operand.vmem [shape: f32[1,128], index: 3, kind: input, shape index: {}]   ;;  %s1129_s4 = inlined_call_operand.vmem [shape: bf16[128,128], index: 4, kind: input, shape index: {}]   ;;  %s1130_s5 = inlined_call_operand.vmem [shape: f32[1,128], index: 5, kind: input, shape index: {}]   ;;  %s1131_s6 = inlined_call_operand.vmem [shape: bf16[128,8], index: 6, kind: input, shape index: {}]   ;;  %s1132_s7 = inlined_call_operand.vmem [shape: f32[1,8], index: 7, kind: input, shape index: {}]   ;;  %s1133_s8 = inlined_call_operand.vmem [shape: f32[64,8], index: 8, kind: output, shape index: {}]  }
   0x1 LB: > { %s798_s28 = sadd.s32 4294967295, %s978_s27   ;;  %p802_p0 = scmp.ge.s32.totalorder %s978_s27, 1  ;;  %s978_s27 = sphi %s1025_s27, %s18_s27  }
   0x2   : > { %p274_p1 = scmp.lt.s32.totalorder %s978_s27, 3 }
   0x4   : > { %p275_p2 = pnand %p802_p0, %p274_p1 }
   0x5   : > { %v923_v0 = vld [vmem:[%s1127_s2] sm:$0xff] (!%p275_p2)   ;;  %s803_s9 = sshll.u32 (!%p275_p2), %s798_s28, 2  ;;  %v925_v2 = vld [vmem:[%s1129_s4 + $0x8] sm:$0xff] (!%p275_p2)   ;;  %v926_v3 = vld [vmem:[%s1129_s4 + $0x10] sm:$0xff] (!%p275_p2)   ;;  %vm353_vm0 = vcmask (!%p275_p2), 130048   ;;  %vm681_vm1 = vcmask (!%p275_p2), 64512  }
   0x6   : > { %278 = sbr.rel (%p275_p2) target bundleno = 1022 (0x3fe), region = 52  ;;  %p314_p3 = scmp.lt.s32.totalorder (!%p275_p2), %s803_s9, 7  ;;  %869 = vmatprep.subr.bf16.mxu0 (!%p275_p2), %v923_v0  ;;  %v924_v1 = vld [vmem:[%s1129_s4] sm:$0xff] (!%p275_p2)   ;;  %v927_v10 = vld [vmem:[%s1129_s4 + $0x18] sm:$0xff] (!%p275_p2)   ;;  %v929_v12 = vld [vmem:[%s1129_s4 + $0x28] sm:$0xff] (!%p275_p2)  }
   0x7   : > { %870 = vmatpush3.bf16.msra.mxu0 (!%p275_p2), %v923_v0  ;;  %875 = vmatprep.subr.bf16.mxu1 (!%p275_p2), %v924_v1  ;;  %v928_v11 = vld [vmem:[%s1129_s4 + $0x20] sm:$0xff] (!%p275_p2)   ;;  %v930_v13 = vld [vmem:[%s1129_s4 + $0x30] sm:$0xff] (!%p275_p2)   ;;  %v931_v14 = vld [vmem:[%s1129_s4 + $0x38] sm:$0xff] (!%p275_p2)  }
   0x8   : > { %876 = vmatpush3.bf16.msra.mxu1 (!%p275_p2), %v924_v1  ;;  %v932_v15 = vld [vmem:[%s1131_s6] sm:$0xff] (!%p275_p2)   ;;  %v933_v16 = vld [vmem:[%s1131_s6 + $0x8] sm:$0xff] (!%p275_p2)   ;;  %v934_v17 = vld [vmem:[%s1131_s6 + $0x10] sm:$0xff] (!%p275_p2)  }
   0x9   : > { %877 = vmatprep.subr.bf16.mxu1 (!%p275_p2), %v925_v2  ;;  %895 = vmatprep.subr.bf16.mxu0 (!%p275_p2), %v932_v15  ;;  %v809_v18 = vld [vmem:[%s1128_s3] ss:$0 sm:$0xff] (!%p275_p2)  ;;  %v935_v33 = vld [vmem:[%s1131_s6 + $0x18] sm:$0xff] (!%p275_p2)   ;;  %v937_v35 = vld [vmem:[%s1131_s6 + $0x28] sm:$0xff] (!%p275_p2)  }
   0xa   : > { %v936_v34 = vld [vmem:[%s1131_s6 + $0x20] sm:$0xff] (!%p275_p2)   ;;  %v938_v36 = vld [vmem:[%s1131_s6 + $0x30] sm:$0xff] (!%p275_p2)   ;;  %v939_v37 = vld [vmem:[%s1131_s6 + $0x38] sm:$0xff] (!%p275_p2)  }
   0xb   : > { %v813_v38 = vld [vmem:[%s1130_s5] ss:$0 sm:$0xff] (!%p275_p2) }
   0xc   : > { %878 = vmatpush3.bf16.msra.mxu1 (!%p275_p2), %v925_v2  ;;  %v822_v62 = vld [vmem:[%s1132_s7] ss:$0 sm:$0xff] (!%p275_p2) }
   0xd   : > { %s1135_s9 = smov (!%p314_p3, %s803_s9), 7  ;;  %879 = vmatprep.subr.bf16.mxu1 %v926_v3 }
   0xe   : > { %s804_s14 = sshll.u32 %s1135_s9, 3  ;;  %s806_s11 = sshll.u32 %s1135_s9, 2 }
   0xf   : > { %s317_s19 = scalar_lea.vmem %s1125_s0, %s804_s14  ;;  %s323_s15 = scalar_lea.vmem %s1126_s1, %s806_s11 }
  0x10   : > { %v332_v4 = vld [vmem:[%s317_s19] sm:$0xff]  ;;  %v333_v5 = vld [vmem:[%s317_s19 + $0x8] sm:$0xff]  ;;  %v334_v6 = vld [vmem:[%s317_s19 + $0x10] sm:$0xff]  ;;  %880 = vmatpush3.bf16.msra.mxu1 %v926_v3  ;;  %s329_s20 = scalar_lea.vmem %s1133_s8, %s804_s14 }
  0x11   : > { %v336_v7 = vpack.c.bf16 %v333_v5, %v332_v4  ;;  %v335_v8 = vld [vmem:[%s317_s19 + $0x18] sm:$0xff]  ;;  %881 = vmatprep.subr.bf16.mxu1 %v927_v10  ;;  %v845_v53 = vld [vmem:[%s323_s15 + $0x8] sm:$0xff]   ;;  %v838_v54 = vld [vmem:[%s323_s15] sm:$0xff]  }
  0x12   : > { %v337_v9 = vpack.c.bf16 %v335_v8, %v334_v6  ;;  %v843_v55 = vunpack.c.l.bf16 %v845_v53  ;;  %v839_v56 = vunpack.c.l.bf16 %v838_v54  ;;  %v844_v57 = vunpack.c.h.bf16 %v845_v53 }
  0x13   : > { %871 = vmatprep.mubr.msk.bf16.mxu0 %vm353_vm0, %v336_v7  ;;  %v840_v58 = vunpack.c.h.bf16 %v838_v54 }
  0x14   : > { %872 = vmatmul.mubr.msk.bf16.vlgmr.msra.gmra.mrb[0].mxu0 %vm353_vm0, %v337_v9  ;;  %882 = vmatpush3.bf16.msra.mxu1 %v927_v10  ;;  %v833_v59 = vadd.f32 -1.0, %v843_v55  ;;  %v831_v60 = vadd.f32 -1.0, %v839_v56  ;;  %v834_v61 = vadd.f32 -1.0, %v844_v57 }
  0x15   : > { %883 = vmatprep.subr.bf16.mxu1 %v928_v11  ;;  %896 = vmatpush3.bf16.msra.mxu0 %v932_v15  ;;  %v832_v63 = vadd.f32 -1.0, %v840_v58 }
  0x16   : > { %897 = vmatprep.subr.bf16.mxu0 %v933_v16  ;;  %v675_v0 = vmul.f32 1e+10, %v833_v59  ;;  %v673_v2 = vmul.f32 1e+10, %v831_v60  ;;  %v676_v5 = vmul.f32 1e+10, %v834_v61 }
  0x17   : > { %v674_v8 = vmul.f32 1e+10, %v832_v63 }
  0x18   : > { %884 = vmatpush3.bf16.msra.mxu1 %v928_v11 }
  0x19   : > { %885 = vmatprep.subr.bf16.mxu1 %v929_v12  ;;  %898 = vmatpush3.bf16.msra.mxu0 %v933_v16 }
  0x1a   : > { %899 = vmatprep.subr.bf16.mxu0 %v934_v17 }
  0x1c   : > { %886 = vmatpush3.bf16.msra.mxu1 %v929_v12 }
  0x1d   : > { %887 = vmatprep.subr.bf16.mxu1 %v930_v13  ;;  %900 = vmatpush3.bf16.msra.mxu0 %v934_v17 }
  0x1e   : > { %901 = vmatprep.subr.bf16.mxu0 %v935_v33 }
  0x20   : > { %888 = vmatpush3.bf16.msra.mxu1 %v930_v13 }
  0x21   : > { %889 = vmatprep.subr.bf16.mxu1 %v931_v14  ;;  %902 = vmatpush3.bf16.msra.mxu0 %v935_v33 }
  0x22   : > { %903 = vmatprep.subr.bf16.mxu0 %v936_v34 }
  0x24   : > { %890 = vmatpush3.bf16.msra.mxu1 %v931_v14 }
  0x25   : > { %904 = vmatpush3.bf16.msra.mxu0 %v936_v34 }
  0x26   : > { %905 = vmatprep.subr.bf16.mxu0 %v937_v35 }
  0x29   : > { %906 = vmatpush3.bf16.msra.mxu0 %v937_v35 }
  0x2a   : > { %907 = vmatprep.subr.bf16.mxu0 %v938_v36 }
  0x2d   : > { %908 = vmatpush3.bf16.msra.mxu0 %v938_v36 }
  0x2e   : > { %909 = vmatprep.subr.bf16.mxu0 %v939_v37 }
  0x31   : > { %910 = vmatpush3.bf16.msra.mxu0 %v939_v37 }
  0xe7   : > { %v873_v19 = vpop.f32.mrb[0].mxu0 }
  0xe8   : > { %v403_v20 = vadd.f32 %v873_v19, %v809_v18  ;;  %v394_v21 = vpop.f32.mrb[1].mxu0 }
  0xe9   : > { %v395_v22 = vadd.f32 %v809_v18, %v394_v21  ;;  %v874_v23 = vpop.f32.mrb[2].mxu0 }
  0xea   : > { %940 = vtanh.f32 %v403_v20  ;;  %v406_v24 = vadd.f32 %v874_v23, %v809_v18  ;;  %v397_v25 = vpop.f32.mrb[3].mxu0 }
  0xeb   : > { %942 = vtanh.f32 %v395_v22  ;;  %v398_v26 = vadd.f32 %v809_v18, %v397_v25 }
  0xec   : > { %944 = vtanh.f32 %v406_v24 }
  0xed   : > { %946 = vtanh.f32 %v398_v26 }
  0xf4   : > { %v941_v27 = vpop.eup %940 }
  0xf5   : > { %v943_v28 = vpop.eup %942 }
  0xf6   : > { %v945_v29 = vpop.eup %944 }
  0xf7   : > { %v947_v30 = vpop.eup %946  ;;  %v414_v31 = vpack.c.bf16 %v945_v29, %v941_v27 }
  0xf8   : > { %v413_v32 = vpack.c.bf16 %v947_v30, %v943_v28 }
  0xfa   : > { %891 = vmatprep.mubr.bf16.mxu1 %v413_v32 }
  0xfb   : > { %892 = vmatmul.mubr.bf16.vlgmr.msra.gmra.mrb[0].mxu1 %v414_v31 }
 0x1ce   : > { %v893_v39 = vpop.f32.mrb[0].mxu1 }
 0x1cf   : > { %v529_v40 = vadd.f32 %v893_v39, %v813_v38  ;;  %v520_v41 = vpop.f32.mrb[1].mxu1 }
 0x1d0   : > { %v521_v42 = vadd.f32 %v813_v38, %v520_v41  ;;  %v894_v43 = vpop.f32.mrb[2].mxu1 }
 0x1d1   : > { %948 = vtanh.f32 %v529_v40  ;;  %v532_v44 = vadd.f32 %v894_v43, %v813_v38  ;;  %v523_v45 = vpop.f32.mrb[3].mxu1 }
 0x1d2   : > { %950 = vtanh.f32 %v521_v42  ;;  %v524_v46 = vadd.f32 %v813_v38, %v523_v45 }
 0x1d3   : > { %952 = vtanh.f32 %v532_v44 }
 0x1d4   : > { %954 = vtanh.f32 %v524_v46 }
 0x1db   : > { %v949_v47 = vpop.eup %948 }
 0x1dc   : > { %v951_v48 = vpop.eup %950 }
 0x1dd   : > { %v953_v49 = vpop.eup %952 }
 0x1de   : > { %v955_v50 = vpop.eup %954  ;;  %v540_v51 = vpack.c.bf16 %v953_v49, %v949_v47 }
 0x1df   : > { %v539_v52 = vpack.c.bf16 %v955_v50, %v951_v48 }
 0x1e1   : > { %911 = vmatprep.mubr.bf16.mxu0 %v539_v52 }
 0x1e2   : > { %912 = vmatmul.mubr.bf16.vlgmr.msra.gmra.mrb[4].mxu0 %v540_v51 }
 0x2b5   : > { %v913_v1 = vpop.f32.mrb[4].mxu0 }
 0x2b6   : > { %v655_v3 = vadd.f32 %v913_v1, %v822_v62  ;;  %v646_v4 = vpop.f32.mrb[5].mxu0 }
 0x2b7   : > { %v647_v6 = vadd.f32 %v822_v62, %v646_v4  ;;  %v914_v7 = vpop.f32.mrb[6].mxu0 }
 0x2b8   : > { %v658_v9 = vadd.f32 %v914_v7, %v822_v62  ;;  %v649_v10 = vpop.f32.mrb[7].mxu0  ;;  %v679_v11 = vadd.f32 %v675_v0, %v655_v3 }
 0x2b9   : > { %v650_v12 = vadd.f32 %v822_v62, %v649_v10  ;;  %v677_v13 = vadd.f32 %v673_v2, %v647_v6 }
 0x2ba   : > { %v688_v14 = vsel %vm681_vm1, %v679_v11, -inf  ;;  %v680_v15 = vadd.f32 %v676_v5, %v658_v9 }
 0x2bb   : > { %689 = vmax.xlane.f32.xlu1 %v688_v14  ;;  %v682_v16 = vsel %vm681_vm1, %v677_v13, -inf  ;;  %v678_v17 = vadd.f32 %v674_v8, %v650_v12 }
 0x2bc   : > { %683 = vmax.xlane.f32.xlu0 %v682_v16  ;;  %v691_v18 = vsel %vm681_vm1, %v680_v15, -inf }
 0x2bd   : > { %v685_v19 = vsel %vm681_vm1, %v678_v17, -inf }
 0x2bf   : > { %692 = vmax.xlane.f32.xlu1 %v691_v18 }
 0x2c0   : > { %686 = vmax.xlane.f32.xlu0 %v685_v19 }
 0x348   : > { %v690_v20 = vpop.xlane.xlu1 %689 }
 0x349   : > { %v696_v21 = vsub.f32 %v679_v11, %v690_v20  ;;  %v684_v22 = vpop.xlane.xlu0 %683 }
 0x34a   : > { %v694_v23 = vsub.f32 %v677_v13, %v684_v22 }
 0x34b   : > { %v702_v24 = vmul.f32 1.442695, %v696_v21 }
 0x34c   : > { %v698_v25 = vmul.f32 1.442695, %v694_v23  ;;  %v693_v26 = vpop.xlane.xlu1 %692 }
 0x34d   : > { %v697_v27 = vsub.f32 %v680_v15, %v693_v26  ;;  %v687_v28 = vpop.xlane.xlu0 %686 }
 0x34e   : > { %956 = vpow2.f32 %v698_v25  ;;  %v695_v29 = vsub.f32 %v678_v17, %v687_v28 }
 0x34f   : > { %958 = vpow2.f32 %v702_v24  ;;  %v704_v30 = vmul.f32 1.442695, %v697_v27 }
 0x350   : > { %v700_v31 = vmul.f32 1.442695, %v695_v29 }
 0x352   : > { %960 = vpow2.f32 %v700_v31 }
 0x353   : > { %962 = vpow2.f32 %v704_v30 }
 0x358   : > { %v957_v32 = vpop.eup %956 }
 0x359   : > { %v706_v33 = vsel %vm681_vm1, %v957_v32, 0.0  ;;  %v959_v34 = vpop.eup %958 }
 0x35a   : > { %707 = vadd.xlane.f32.xlu0 %v706_v33  ;;  %v712_v36 = vsel %vm681_vm1, %v959_v34, 0.0 }
 0x35c   : > { %v961_v35 = vpop.eup %960 }
 0x35d   : > { %v709_v37 = vsel %vm681_vm1, %v961_v35, 0.0  ;;  %v963_v38 = vpop.eup %962 }
 0x35e   : > { %713 = vadd.xlane.f32.xlu0 %v712_v36  ;;  %710 = vadd.xlane.f32.xlu1 %v709_v37  ;;  %v715_v39 = vsel %vm681_vm1, %v963_v38, 0.0 }
 0x362   : > { %716 = vadd.xlane.f32.xlu1 %v715_v39 }
 0x3e7   : > { %v708_v40 = vpop.xlane.xlu0 %707 }
 0x3e8   : > { %964 = vrcp.f32 %v708_v40 }
 0x3eb   : > { %v711_v41 = vpop.xlane.xlu1 %710  ;;  %v714_v42 = vpop.xlane.xlu0 %713 }
 0x3ec   : > { %966 = vrcp.f32 %v711_v41 }
 0x3ed   : > { %968 = vrcp.f32 %v714_v42 }
 0x3ef   : > { %v717_v43 = vpop.xlane.xlu1 %716 }
 0x3f0   : > { %970 = vrcp.f32 %v717_v43 }
 0x3f2   : > { %v965_v44 = vpop.eup %964 }
 0x3f3   : > { %v719_v45 = vmul.f32 %v965_v44, %v957_v32 }
 0x3f5   : > { %726 = vst.msk [vmem:[%s329_s20] sm:$0xff] %vm681_vm1, %v719_v45 }
 0x3f6   : > { %v967_v46 = vpop.eup %966 }
 0x3f7   : > { %v969_v47 = vpop.eup %968  ;;  %v721_v48 = vmul.f32 %v967_v46, %v961_v35 }
 0x3f8   : > { %v723_v49 = vmul.f32 %v969_v47, %v959_v34 }
 0x3f9   : > { %727 = vst.msk [vmem:[%s329_s20 + $0x8] sm:$0xff] %vm681_vm1, %v721_v48 }
 0x3fa   : > { %v971_v50 = vpop.eup %970  ;;  %728 = vst.msk [vmem:[%s329_s20 + $0x10] sm:$0xff] %vm681_vm1, %v723_v49 }
 0x3fb   : > { %v725_v51 = vmul.f32 %v971_v50, %v963_v38 }
 0x3fd   : > { %729 = vst.msk [vmem:[%s329_s20 + $0x18] sm:$0xff] %vm681_vm1, %v725_v51 }
 0x3fe PF: > { %s18_s27 = sadd.s32 1, %s978_s27  }
 0x3ff   : > { %p15_p4 = scmp.ge.s32.totalorder %s18_s27, 4  }
 0x401   :  { %17 = sbr.rel (!%p15_p4) target bundleno = 1 (0x1), region = 85 }

</bundles_post_ra>
